<compile_context>
chip_gen: v5e
topology: v5e:2x2
jax: 0.10.0
libtpu: 0.0.40
codegen_flags: <defaults>
</compile_context>

<pallas_src>
import functools
import re

import jax
import jax.numpy as jnp
from jax.experimental import pallas as pl
from jax.experimental.pallas import tpu as pltpu


def _round_up(x, m):
    return ((x + m - 1) // m) * m


def _cdiv(a, b):
    return (a + b - 1) // b


def _tpu_generation():
    """Best-effort TPU generation number (e.g. 5 for v5e, 6 for v6e, 7 for v7x)."""
    try:
        kind = jax.devices()[0].device_kind
    except Exception:
        return 6
    m = re.search(r"(\d+)", kind)
    return int(m.group(1)) if m else 6


def _default_matmul_dtype(gen):
    # v6e/v7x MXUs are natively bf16; keep f32 inputs on older generations.
    return jnp.bfloat16 if gen >= 6 else jnp.float32


def _choose_row_tile(n_patches, batch, row_align, row_cap, min_steps=4):
    """Largest aligned per-batch patch-row tile that still yields >= min_steps
    grid steps (feeds both v7x TensorCores and hides per-step overhead)."""
    tp = min(_round_up(n_patches, row_align), _round_up(row_cap, row_align))
    while tp > row_align and batch * _cdiv(n_patches, tp) < min_steps:
        tp = max(row_align, _round_up(tp // 2, row_align))
    return tp


def _patch_embed_kernel(patches_ref, w_ref, addend_ref, out_ref, *, tp):
    # patches_ref: (1, tp, Kp)   row tile of flattened patches (one batch)
    # w_ref:       (Kp, Hp)      full flattened conv weight, VMEM-resident
    # addend_ref:  (np_pad, Hp)  pos_emb[1:] + conv bias, VMEM-resident
    # out_ref:     (1, tp, Hp)   lane-dense projection tile
    i = pl.program_id(1)
    proj = jnp.dot(patches_ref[0], w_ref[...],
                   preferred_element_type=jnp.float32)          # MXU, f32 acc
    row0 = pl.multiple_of(i * tp, 8)                            # sublane-aligned
    addend = addend_ref[pl.ds(row0, tp), :]
    out_ref[0] = (proj + addend).astype(out_ref.dtype)


def prepare_patch_embed_params(conv_w, conv_b, cls_token, pos_emb, patch_size,
                               *, matmul_dtype=None, out_dtype=jnp.float32):
    """Hoistable (call-once) preprocessing of the static parameters."""
    gen = _tpu_generation()
    if matmul_dtype is None:
        matmul_dtype = _default_matmul_dtype(gen)
    hidden = conv_w.shape[0]
    C = conv_w.shape[1]
    ph, pw = patch_size
    K = C * ph * pw
    Kp = _round_up(K, 128)            # lane-dense contraction dim
    Hp = _round_up(hidden, 128)       # lane-dense output dim

    w_flat = conv_w.reshape(hidden, K).T.astype(matmul_dtype)   # (K, hidden)
    w_flat = jnp.pad(w_flat, ((0, Kp - K), (0, Hp - hidden)))   # (Kp, Hp)

    # Single addend (pos_emb rows 1.. + conv bias); kept f32 so the
    # post-matmul add stays f32 regardless of the matmul input dtype.
    addend = (pos_emb[1:, :] + conv_b[None, :]).astype(jnp.float32)
    addend = jnp.pad(addend, ((0, 0), (0, Hp - hidden)))        # (N, Hp)

    cls_row = (cls_token + pos_emb[0]).astype(jnp.float32)      # (hidden,)

    return dict(w_flat=w_flat, addend=addend, cls_row=cls_row,
                hidden=hidden, K=K, Kp=Kp, Hp=Hp, patch_size=(ph, pw),
                matmul_dtype=matmul_dtype, out_dtype=out_dtype, gen=gen)


def patch_embed_forward(x, params):
    """x: (B, C, H, W) NCHW. Returns (B, n_patches + 1, hidden) in out_dtype."""
    B, C, H, W = x.shape
    ph, pw = params["patch_size"]
    hidden, K, Kp, Hp = params["hidden"], params["K"], params["Kp"], params["Hp"]
    matmul_dtype, out_dtype = params["matmul_dtype"], params["out_dtype"]
    gen = params["gen"]
    nh, nw = H // ph, W // pw
    n_patches = nh * nw

    # --- glue: non-overlapping patch extraction; the (C, ph, pw) flattening
    # order matches Conv2d(kernel=stride=patch) weight flattening.
    # TODO(synk): fold this transpose into the kernel for large images.
    patches = x.reshape(B, C, nh, ph, nw, pw).transpose(0, 2, 4, 1, 3, 5)
    patches = patches.reshape(B, n_patches, K).astype(matmul_dtype)

    # --- row tiling: 16-aligned for bf16 sublane packing (8 for f32);
    # capped at 512 rows on v5e/v6e (128 MiB VMEM), 256 on v7x (64 MiB).
    row_align = 16 if jnp.dtype(matmul_dtype).itemsize < 4 else 8
    row_cap = 256 if gen >= 7 else 512
    tp = _choose_row_tile(n_patches, B, row_align, row_cap)
    np_pad = _round_up(n_patches, tp)

    patches = jnp.pad(patches, ((0, 0), (0, np_pad - n_patches), (0, Kp - K)))
    addend = jnp.pad(params["addend"], ((0, np_pad - n_patches), (0, 0)))

    grid = (B, np_pad // tp)

    # --- VMEM budget: double-buffered patch/out tiles + (conservatively
    # double-counted) resident weight and addend, with headroom; capped well
    # below physical VMEM (56 MiB on v7x, 100 MiB on v5e/v6e).
    in_bytes = jnp.dtype(matmul_dtype).itemsize
    out_bytes = jnp.dtype(out_dtype).itemsize
    est = (2 * tp * Kp * in_bytes + 2 * Kp * Hp * in_bytes
           + 2 * np_pad * Hp * 4 + 2 * tp * Hp * out_bytes)
    vmem_cap = (56 if gen >= 7 else 100) * 2**20
    vmem_limit = int(min(vmem_cap, max(8 * 2**20, 2 * est)))

    proj = pl.pallas_call(
        functools.partial(_patch_embed_kernel, tp=tp),
        out_shape=jax.ShapeDtypeStruct((B, np_pad, Hp), out_dtype),
        grid_spec=pltpu.PrefetchScalarGridSpec(
            num_scalar_prefetch=0,
            grid=grid,
            in_specs=[
                pl.BlockSpec((1, tp, Kp), lambda b, i: (b, i, 0)),
                # Constant block indices: fetched into VMEM once and reused
                # for every grid step (no per-step weight/addend re-DMA).
                pl.BlockSpec((Kp, Hp), lambda b, i: (0, 0)),
                pl.BlockSpec((np_pad, Hp), lambda b, i: (0, 0)),
            ],
            out_specs=pl.BlockSpec((1, tp, Hp), lambda b, i: (b, i, 0)),
        ),
        compiler_params=pltpu.CompilerParams(
            dimension_semantics=("parallel", "parallel"),
            vmem_limit_bytes=vmem_limit),
    )(patches, params["w_flat"], addend)

    # --- final assembly outside the grid: drop row/lane padding, prepend the
    # single cls row (cls token + pos_emb[0]); no in-kernel concatenate.
    body = proj[:, :n_patches, :hidden]
    cls_rows = jnp.broadcast_to(
        params["cls_row"][None, None, :], (B, 1, hidden)).astype(out_dtype)
    return jnp.concatenate([cls_rows, body], axis=1)


def embeddings_forward(x, conv_w, conv_b, cls_token, pos_emb, patch_size,
                       *, matmul_dtype=None, out_dtype=jnp.float32):
    params = prepare_patch_embed_params(
        conv_w, conv_b, cls_token, pos_emb, patch_size,
        matmul_dtype=matmul_dtype, out_dtype=out_dtype)
    return patch_embed_forward(x, params)


def embeddings_reference(x, conv_w, conv_b, cls_token, pos_emb, patch_size):
    """Pure-JAX reference (equivalent of the PyTorch forward, eval mode)."""
    B, C, H, W = x.shape
    ph, pw = patch_size
    hidden = conv_w.shape[0]
    nh, nw = H // ph, W // pw
    n_patches = nh * nw
    K = C * ph * pw
    patches = x.reshape(B, C, nh, ph, nw, pw).transpose(0, 2, 4, 1, 3, 5)
    patches = patches.reshape(B, n_patches, K)
    proj = jnp.einsum("bnk,kh->bnh", patches, conv_w.reshape(hidden, K).T) + conv_b
    cls = jnp.broadcast_to(cls_token.reshape(1, 1, hidden), (B, 1, hidden))
    seq = jnp.concatenate([cls, proj], axis=1)
    return seq + pos_emb[None, :, :]


if __name__ == "__main__":
    # Small shapes consistent with the module: img_size=16, patch_size=4,
    # in_channels=3, hidden_size=32 -> n_patches = (16/4)*(16/4) = 16.
    B, C, H, W = 2, 3, 16, 16
    ph, pw = 4, 4
    hidden = 32
    n_patches = (H // ph) * (W // pw)

    key = jax.random.PRNGKey(0)
    kx, kw, kb, kc, kp = jax.random.split(key, 5)
    x = jax.random.normal(kx, (B, C, H, W), dtype=jnp.float32)
    conv_w = jax.random.normal(kw, (hidden, C, ph, pw), dtype=jnp.float32) * 0.02
    conv_b = jax.random.normal(kb, (hidden,), dtype=jnp.float32) * 0.02
    # Module inits these to zeros; use small random values for a nontrivial test.
    cls_token = jax.random.normal(kc, (hidden,), dtype=jnp.float32) * 0.02
    pos_emb = jax.random.normal(kp, (n_patches + 1, hidden), dtype=jnp.float32) * 0.02

    ref = embeddings_reference(x, conv_w, conv_b, cls_token, pos_emb, (ph, pw))

    # Exact-semantics f32 path.
    out = embeddings_forward(x, conv_w, conv_b, cls_token, pos_emb, (ph, pw),
                             matmul_dtype=jnp.float32)
    out = jax.block_until_ready(out)
    assert out.shape == (B, n_patches + 1, hidden)
    assert jnp.allclose(out, ref, atol=1e-5, rtol=1e-5)

    # Device-default path (bf16 inputs + f32 accumulation on v6e/v7x), reusing
    # the hoisted (call-once) parameter preprocessing.
    params = prepare_patch_embed_params(conv_w, conv_b, cls_token, pos_emb,
                                        (ph, pw))
    out_auto = patch_embed_forward(x, params)
    out_auto = jax.block_until_ready(out_auto)
    assert out_auto.shape == (B, n_patches + 1, hidden)
    assert jnp.allclose(out_auto, ref, atol=2e-2, rtol=2e-2)

    print("KERNEL_OK")
</pallas_src>

<mosaic_0001>
module attributes {stable_mosaic.version = 11 : i64} {
  func.func @_patch_embed_kernel(%arg0: i32, %arg1: i32, %arg2: memref<1x8x128xf32, #tpu.memory_space<vmem>>, %arg3: memref<128x128xf32, #tpu.memory_space<vmem>>, %arg4: memref<16x128xf32, #tpu.memory_space<vmem>>, %arg5: memref<1x8x128xf32, #tpu.memory_space<vmem>>) attributes {dimension_semantics = [#tpu.dimension_semantics<parallel>, #tpu.dimension_semantics<parallel>], iteration_bounds = array<i64: 2, 2>, scalar_prefetch = 0 : i64, scratch_operands = 0 : i64, tpu.core_type = #tpu.core_type<tc>, window_params = [{transform_indices = @transform_0, window_bounds = array<i64: 1, 8, 128>}, {pipeline_mode = #tpu.pipeline_mode<synchronous>, transform_indices = @transform_1, window_bounds = array<i64: 128, 128>}, {pipeline_mode = #tpu.pipeline_mode<synchronous>, transform_indices = @transform_2, window_bounds = array<i64: 16, 128>}, {transform_indices = @transform_3, window_bounds = array<i64: 1, 8, 128>}]} {
    %c0 = arith.constant 0 : index
    %c0_0 = arith.constant 0 : index
    %c0_1 = arith.constant 0 : index
    %0 = vector.load %arg2[%c0, %c0_0, %c0_1] : memref<1x8x128xf32, #tpu.memory_space<vmem>>, vector<1x8x128xf32>
    %1 = vector.shape_cast %0 : vector<1x8x128xf32> to vector<8x128xf32>
    %c0_2 = arith.constant 0 : index
    %c0_3 = arith.constant 0 : index
    %2 = vector.load %arg3[%c0_2, %c0_3] : memref<128x128xf32, #tpu.memory_space<vmem>>, vector<128x128xf32>
    %cst = arith.constant dense<0.000000e+00> : vector<8x128xf32>
    %3 = tpu.matmul %1, %2, %cst {dimension_numbers = #tpu.dot_dimension_numbers<[1], [0], [0], [1], [0, 0, 1, 1], [], []>} : vector<8x128xf32>, vector<128x128xf32>, vector<8x128xf32> -> vector<8x128xf32>
    %c8_i32 = arith.constant 8 : i32
    %4 = arith.muli %arg1, %c8_i32 : i32
    %5 = tpu.assume_multiple %4, 8 : i32
    %6 = arith.index_cast %5 : i32 to index
    %c0_4 = arith.constant 0 : index
    %7 = vector.load %arg4[%6, %c0_4] : memref<16x128xf32, #tpu.memory_space<vmem>>, vector<8x128xf32>
    %8 = arith.addf %3, %7 : vector<8x128xf32>
    %c0_5 = arith.constant 0 : index
    %c0_6 = arith.constant 0 : index
    %c0_7 = arith.constant 0 : index
    %9 = vector.load %arg5[%c0_5, %c0_6, %c0_7] : memref<1x8x128xf32, #tpu.memory_space<vmem>>, vector<1x8x128xf32>
    %10 = vector.shape_cast %9 : vector<1x8x128xf32> to vector<8x128xf32>
    %11 = vector.shape_cast %8 : vector<8x128xf32> to vector<1x8x128xf32>
    tpu.vector_store %arg5[%c0_5, %c0_6, %c0_7], %11 {strides = array<i32>} : memref<1x8x128xf32, #tpu.memory_space<vmem>>, vector<1x8x128xf32>,
    return
  }
  func.func @transform_0(%arg0: i32, %arg1: i32) -> (i32, i32, i32) {
    %c0_i32 = arith.constant 0 : i32
    %c0_i32_0 = arith.constant 0 : i32
    return %arg0, %arg1, %c0_i32 : i32, i32, i32
  }
  func.func @transform_1(%arg0: i32, %arg1: i32) -> (i32, i32) {
    %c0_i32 = arith.constant 0 : i32
    %c0_i32_0 = arith.constant 0 : i32
    %c0_i32_1 = arith.constant 0 : i32
    return %c0_i32, %c0_i32_0 : i32, i32
  }
  func.func @transform_2(%arg0: i32, %arg1: i32) -> (i32, i32) {
    %c0_i32 = arith.constant 0 : i32
    %c0_i32_0 = arith.constant 0 : i32
    %c0_i32_1 = arith.constant 0 : i32
    return %c0_i32, %c0_i32_0 : i32, i32
  }
  func.func @transform_3(%arg0: i32, %arg1: i32) -> (i32, i32, i32) {
    %c0_i32 = arith.constant 0 : i32
    %c0_i32_0 = arith.constant 0 : i32
    return %arg0, %arg1, %c0_i32 : i32, i32, i32
  }
}

</mosaic_0001>

<bundles_post_ra>
// kernel: tpu_custom_call.1
= control target key start
LH: loop header
LB: loop body
LE: loop exit
PB: predicated region body
PF: predicated region fallthrough
CT: control target
= control target key end

     0   :  { %s925_s0 = inlined_call_operand.hbm [shape: f32[2,16,128], index: 0, kind: input, shape index: {}]   ;;  %s926_s1 = inlined_call_operand.hbm [shape: f32[128,128], index: 1, kind: input, shape index: {}]   ;;  %s927_s2 = inlined_call_operand.hbm [shape: f32[16,128], index: 2, kind: input, shape index: {}]   ;;  %s928_s3 = inlined_call_operand.hbm [shape: f32[2,16,128], index: 3, kind: output, shape index: {}]  }
   0x1   :  { %931 = sst [smem:[#allocation14_spill]] %s926_s1 }
   0x2   :  { %932 = sst [smem:[#allocation15_spill]] %s927_s2 }
   0x3   :  { %8 = vsyncpa [#allocation3], 0 }
   0x4   :  { %10 = vsyncpa [#allocation3 + $0x1], 0 }
   0x5   :  { %11 = vsyncpa [#allocation6], 0 }
   0x6   :  { %12 = vsyncpa [#allocation4], 0 }
   0x7   :  { %14 = vsyncpa [#allocation4 + $0x1], 0  ;;  %s743_s12 = smov 0   ;;  %s745_s13 = smov 0  }
   0x8   :  { %s747_s14 = smov 0   ;;  %s749_s15 = smov 0  }
   0x9   :  { %s751_s16 = smov 0   ;;  %s753_s17 = smov 0  }
   0xa   :  { %s755_s18 = smov 0   ;;  %s757_s19 = smov 0  }
   0xb LB: > { %s404_s20 = sadd.s32 4294967295, %s717_s19   ;;  %p406_p0 = scmp.ge.s32.totalorder %s717_s19, 1  ;;  %s717_s19 = sphi %s757_s19, %s20_s19   ;;  %s713_s18 = sphi %s755_s18, %s951_s18   ;;  %s709_s17 = sphi %s753_s17, %s950_s17   ;;  %s705_s16 = sphi %s751_s16, %s949_s16   ;;  %s701_s15 = sphi %s749_s15, %s948_s15   ;;  %s697_s14 = sphi %s747_s14, %s947_s14   ;;  %s693_s13 = sphi %s745_s13, %s946_s13   ;;  %s689_s12 = sphi %s743_s12, %s945_s12  }
   0xc   : > { %p787_p1 = scmp.eq.s32.totalorder %s404_s20, 0  ;;  %p135_p2 = scmp.lt.s32.totalorder %s717_s19, 5 }
   0xd   : > { %s934_s1 = sld [smem:[#allocation14_spill]]  ;;  %s719_s26 = smov [#allocation5]  }
   0xe   : > { %p795_p3 = pnand %p406_p0, %p135_p2  ;;  %s148_s27 = sshll.u32 %s719_s26, 4  ;;  %s149_s27 = int_to_ptr.vmem [resolvable:$true] %s148_s27 }
   0xf   : > { %s936_s2 = sld [smem:[#allocation15_spill]]  ;;  %s720_s4 = smov 128  }
  0x10   : > { %p436_p4 = pneg %p795_p3  ;;  %s721_s5 = smov 8  }
  0x11   : > { %s722_s6 = smov [#allocation7]   ;;  %s405_s8 = sadd.s32 4294967294, %s717_s19  }
  0x12   : > { %p437_p5 = pnand %p436_p4, %p787_p1  ;;  %s162_s7 = sshll.u32 %s722_s6, 4  ;;  %s163_s7 = int_to_ptr.vmem [resolvable:$true] %s162_s7 }
  0x13   : > { %s146_s24 = sshll.u32 %s934_s1, 4  ;;  %s29_s9 = sadd.s32 1, %s709_s17  ;;  %s147_s24 = int_to_ptr.hbm [resolvable:$true] %s146_s24 }
  0x14   : > { %439 = dma.hbm_to_vmem [thread:$0]  (!%p437_p5), %s147_s24, 2048, %s149_s27, [#allocation6], %s720_s4, %s720_s4, %s721_s5  }
  0x15   : > { %s160_s30 = sshll.u32 %s936_s2, 4  ;;  %p30_p6 = scmp.ge.s32.totalorder %s29_s9, 2  ;;  %s161_s30 = int_to_ptr.hbm [resolvable:$true] %s160_s30 }
  0x16   : > { %442 = dma.hbm_to_vmem [thread:$0]  (!%p437_p5), %s161_s30, 256, %s163_s7, [#allocation6], %s720_s4, %s720_s4, %s721_s5  }
  0x17   : > { %s32_s10 = sadd.s32 1, %s713_s18  ;;  %s41_s11 = sadd.s32 1, %s697_s14 }
  0x18   : > { %p48_p7 = scmp.ne.s32.totalorder %s697_s14, %s693_s13  ;;  %s953_s9 = smov (%p30_p6, %s29_s9), 0 }
  0x19   : > { %937 = sst [smem:[#allocation12_spill]] %s953_s9  ;;  %s955_s10 = smov (!%p30_p6, %s32_s10), %s713_s18 }
  0x1a   : > { %s37_s22 = ssub.s32 %s709_s17, %s953_s9  ;;  %p49_p8 = scmp.eq.s32.totalorder %s717_s19, 0 }
  0x1b   : > { %p34_p9 = scmp.ge.s32.totalorder %s955_s10, 2  ;;  %p54_p10 = scmp.ne.s32.totalorder %s693_s13, %s689_s12 }
  0x1c   : > { %p820_p11 = por %p49_p8, %p48_p7  ;;  %p122_p12 = scmp.eq.s32.totalorder %s404_s20, 3 }
  0x1d   : > { %s957_s10 = smov (%p34_p9, %s955_s10), 0  ;;  %p830_p13 = por %p787_p1, %p54_p10 }
  0x1e   : > { %939 = sst [smem:[#allocation13_spill]] %s957_s10  ;;  %p834_p0 = por %p122_p12, %p48_p7 }
  0x1f   : > { %s36_s27 = ssub.s32 %s713_s18, %s957_s10  ;;  %p128_p2 = scmp.eq.s32.totalorder %s405_s8, 3 }
  0x20   : > { %s38_s28 = sor.u32 %s37_s22, %s36_s27  ;;  %p453_p4 = scmp.lt.s32.totalorder %s717_s19, 4 }
  0x21   : > { %p39_p5 = scmp.eq.s32.totalorder %s38_s28, 0  ;;  %p841_p6 = por %p128_p2, %p54_p10 }
  0x22   : > { %s176_s29 = sand.u32 1, %s697_s14   ;;  %s411_s30 = sshll.u32 %s713_s18, 1 }
  0x23   : > { %s848_s4 = scalar_select %p39_p5, %s697_s14, %s41_s11  }
  0x24   : > { %s410_s5 = sshll.u32 %s176_s29, 3  ;;  %s184_s6 = sadd.s32 %s709_s17, %s411_s30 }
  0x25   : > { %s412_s7 = sshll.u32 %s184_s6, 3  ;;  %s180_s1 = scalar_lea.vmem [#allocation2], %s410_s5 }
  0x26   : > { %s190_s2 = sshll.u32 %s180_s1, 4  ;;  %s186_s9 = scalar_lea.hbm %s925_s0, %s412_s7  ;;  %s191_s2 = int_to_ptr.vmem [resolvable:$true] %s190_s2 }
  0x27   : > { %s188_s22 = sshll.u32 %s186_s9, 4  ;;  %p444_p7 = pnand %p453_p4, %p820_p11  ;;  %s189_s22 = int_to_ptr.hbm [resolvable:$true] %s188_s22 }
  0x28   : > { %s177_s27 = scalar_lea.sflag [#allocation3], %s176_s29  ;;  %199 = sbr.rel (%p795_p3) target bundleno = 211 (0xd3), region = 32 }
  0x29   : > { %446 = dma.hbm_to_vmem [thread:$0]  (!%p444_p7), %s189_s22, 128, %s191_s2, %s177_s27  }
  0x2a   : > { %s861_s11 = sand.u32 (!%p795_p3), 1, %s693_s13  }
  0x2b   : > { %s414_s1 = sshll.u32 (!%p795_p3), %s861_s11, 3  ;;  %s202_s10 = scalar_lea.sflag (!%p795_p3), [#allocation3], %s861_s11 }
  0x2c   : > { %s867_s9 = scalar_lea.vmem (!%p795_p3), [#allocation2], %s414_s1 }
  0x2d   : > { %676 = dma.done.wait (%p830_p13), %s202_s10, 128  }
  0x2e   : > { %678 = vsyncadd (%p830_p13), %s202_s10, 4294967168 }
  0x2f   : > { %680 = dma.done.wait (%p787_p1), [#allocation6], 2304  }
  0x30   : > { %682 = vsyncadd (%p787_p1), [#allocation6], 4294964992  ;;  %v255_v0 = vld [vmem:[#allocation5 + $0x78] sm:$0xff]  ;;  %v254_v1 = vld [vmem:[#allocation5 + $0x70] sm:$0xff]  ;;  %s420_s2 = sshll.u32 %s705_s16, 1  ;;  %s418_s25 = sshll.u32 %s701_s15, 3 }
  0x31   : > { %259 = vmatpush.msra.mxu0 %v255_v0  ;;  %v253_v2 = vld [vmem:[#allocation5 + $0x68] sm:$0xff]  ;;  %v252_v3 = vld [vmem:[#allocation5 + $0x60] sm:$0xff]  ;;  %v251_v4 = vld [vmem:[#allocation5 + $0x58] sm:$0xff]  ;;  %s291_s21 = sadd.s32 %s701_s15, %s420_s2  ;;  %s257_s30 = scalar_lea.vmem [#allocation7], %s418_s25 }
  0x32   : > { %v250_v5 = vld [vmem:[#allocation5 + $0x50] sm:$0xff]  ;;  %v249_v6 = vld [vmem:[#allocation5 + $0x48] sm:$0xff]  ;;  %v248_v7 = vld [vmem:[#allocation5 + $0x40] sm:$0xff]  ;;  %s421_s23 = sshll.u32 %s291_s21, 3  ;;  %s238_s5 = scalar_lea.vmem [#allocation8], %s414_s1 }
  0x33   : > { %260 = vmatpush.msra.mxu0 %v254_v1  ;;  %v247_v8 = vld [vmem:[#allocation5 + $0x38] sm:$0xff]  ;;  %v246_v9 = vld [vmem:[#allocation5 + $0x30] sm:$0xff]  ;;  %v245_v10 = vld [vmem:[#allocation5 + $0x28] sm:$0xff]  ;;  %s293_s29 = scalar_lea.hbm %s928_s3, %s421_s23  ;;  %s295_s6 = sshll.u32 %s238_s5, 4  ;;  %s296_s6 = int_to_ptr.vmem [resolvable:$true] %s295_s6 }
  0x34   : > { %v244_v11 = vld [vmem:[#allocation5 + $0x20] sm:$0xff]  ;;  %v243_v12 = vld [vmem:[#allocation5 + $0x18] sm:$0xff]  ;;  %v242_v13 = vld [vmem:[#allocation5 + $0x10] sm:$0xff]  ;;  %s297_s7 = sshll.u32 %s293_s29, 4  ;;  %s281_s16 = scalar_lea.sflag [#allocation4], %s861_s11  ;;  %s298_s7 = int_to_ptr.hbm [resolvable:$true] %s297_s7 }
  0x35   : > { %261 = vmatpush.msra.mxu0 %v253_v2  ;;  %v241_v14 = vld [vmem:[#allocation5 + $0x8] sm:$0xff]  ;;  %v240_v15 = vld [vmem:[#allocation5] sm:$0xff]  ;;  %v239_v16 = vld [vmem:[%s867_s9] sm:$0xff]  ;;  %s629_s8 = sshra.s32 %s298_s7, 4  ;;  %s635_s10 = scalar_lea.hbm %s928_s3, 32  ;;  %s630_s8 = int_to_ptr.hbm [resolvable:$true] %s629_s8 }
  0x36   : > { %v258_v17 = vld [vmem:[%s257_s30] sm:$0xff]  ;;  %s631_s15 = scalar_lea.hbm %s630_s8, 8  ;;  %p636_p9 = scmp.lt.s32.totalorder %s630_s8, %s928_s3 }
  0x37   : > { %262 = vmatpush.msra.mxu0 %v252_v3  ;;  %p632_p1 = scmp.ne.s32.totalorder %s630_s8, %s631_s15  ;;  %p637_p10 = scmp.lt.s32.totalorder %s635_s10, %s631_s15 }
  0x39   : > { %263 = vmatpush.msra.mxu0 %v251_v4  ;;  %p633_p3 = pnand %p632_p1, %p834_p0  ;;  %p638_p11 = por %p637_p10, %p636_p9 }
  0x3b   : > { %264 = vmatpush.msra.mxu0 %v250_v5  ;;  %p634_p8 = pneg %p633_p3 }
  0x3d   : > { %265 = vmatpush.msra.mxu0 %v249_v6  ;;  %p639_p12 = pnand %p638_p11, %p634_p8 }
  0x3f   : > { %266 = vmatpush.msra.mxu0 %v248_v7 }
  0x41   : > { %267 = vmatpush.msra.mxu0 %v247_v8 }
  0x43   : > { %268 = vmatpush.msra.mxu0 %v246_v9 }
  0x45   : > { %269 = vmatpush.msra.mxu0 %v245_v10 }
  0x47   : > { %270 = vmatpush.msra.mxu0 %v244_v11 }
  0x49   : > { %271 = vmatpush.msra.mxu0 %v243_v12 }
  0x4b   : > { %272 = vmatpush.msra.mxu0 %v242_v13 }
  0x4d   : > { %273 = vmatpush.msra.mxu0 %v241_v14 }
  0x4f   : > { %274 = vmatpush.msra.mxu0 %v240_v15 }
  0x50   : > { %275 = vmatmul.f32.vlgmr.msra.gmra.mxu0 %v239_v16 }
  0xcd   : > { %v276_v18 = vpop.f32.mrf.mxu0 }
  0xce   : > { %v277_v19 = vadd.f32 %v276_v18, %v258_v17 }
  0xd0   : > { %279 = vst [vmem:[%s238_s5] sm:$0xff] %v277_v19 }
  0xd1   : > { %642 = shalt.err (!%p639_p12)
}
  0xd2   : > { %434 = dma.vmem_to_hbm [thread:$0]  (%p834_p0), %s296_s6, 128, %s298_s7, %s281_s16  }
  0xd3 PF: > { %p456_p13 = scmp.ge.s32.totalorder %s717_s19, 2  ;;  %s309_s11 = sand.u32 1, %s689_s12  }
  0xd4   : > { %s310_s2 = scalar_lea.sflag [#allocation4], %s309_s11 }
  0xd5   : > { %p448_p2 = pnand %p456_p13, %p841_p6 }
  0xd7   : > { %p449_p4 = pneg %p448_p2 }
  0xd9   : > { %684 = dma.done.wait (%p449_p4), %s310_s2, 128  }
  0xda   : > { %686 = vsyncadd (%p449_p4), %s310_s2, 4294967168  ;;  %s20_s19 = sadd.s32 1, %s717_s19   ;;  %s943_s26 = sld [smem:[#allocation12_spill]] }
  0xdb   : > { %p17_p5 = scmp.ge.s32.totalorder %s20_s19, 6   ;;  %s944_s21 = sld [smem:[#allocation13_spill]] }
  0xdc   : > { %s945_s12 = smov %s693_s13  ;;  %s946_s13 = smov %s697_s14 }
  0xdd   : > { %s947_s14 = smov %s848_s4  ;;  %s948_s15 = smov %s709_s17 }
  0xde   : > { %s949_s16 = smov %s713_s18  ;;  %19 = sbr.rel (!%p17_p5) target bundleno = 11 (0xb), region = 86 }
  0xe0   : > { %s950_s17 = smov %s943_s26 }
  0xe1   : > { %s951_s18 = smov %s944_s21 }
  0xe3   :  { %316 = vsyncpa [#allocation3], 1 }
  0xe4   :  { %318 = vsyncpa [#allocation3 + $0x1], 1 }
  0xe5   :  { %319 = vsyncpa [#allocation6], 1 }
  0xe6   :  { %320 = vsyncpa [#allocation4], 1 }
  0xe7   :  { %322 = vsyncpa [#allocation4 + $0x1], 1 }

</bundles_post_ra>
